<compile_context>
chip_gen: v6e
topology: v6e:2x2x1
jax: 0.10.0
libtpu: 0.0.40
codegen_flags: <defaults>
</compile_context>

<pallas_src>
import functools

import jax
import jax.numpy as jnp
import numpy as np
from jax import lax
from jax.experimental import pallas as pl
from jax.experimental.pallas import tpu as pltpu


_TL_TARGET = 512                       # Lout tile (lanes); multiple of 128
_TILE_BYTE_BUDGET = 20 * 1024 * 1024   # per-step VMEM target (fits v7x 64 MiB)


def _convbr1d_kernel(x_ref, halo_ref, w_ref, scale_ref, bias_ref, o_ref,
                     stag_ref, *, K, Cin, TL, dilation, is_activation):
    """One (batch, Lout-tile) grid step, NCL-native (length on lanes).

    x_ref:     (Cin, TL)       input tile = columns [i*TL, (i+1)*TL) of padded x
    halo_ref:  (Cin, Hpad)     right halo = columns [(i+1)*TL, (i+1)*TL + H)
    w_ref:     (Cout, K*Cin)   conv weight, taps folded into the contraction dim
    scale_ref: (Cout, 1)       folded BN scale  = gamma / sqrt(var + eps)
    bias_ref:  (Cout, 1)       folded BN bias   = beta - mean * scale
    o_ref:     (Cout, TL)
    stag_ref:  (K*Cin, TL)     VMEM staging: K shifted copies of the input tile
    """
    # Stack the K dilated taps along the contraction axis so the conv for this
    # tile is a single MXU matmul of depth K*Cin.
    for k in range(K):
        off = k * dilation
        n_main = max(TL - off, 0)                       # columns from x_ref
        if n_main > 0:
            stag_ref[k * Cin:(k + 1) * Cin, 0:n_main] = x_ref[:, off:off + n_main]
        if n_main < TL:                                 # remainder from the halo
            hs = max(off - TL, 0)
            stag_ref[k * Cin:(k + 1) * Cin, n_main:TL] = \
                halo_ref[:, hs:hs + (TL - n_main)]

    y = jnp.dot(w_ref[...], stag_ref[...], preferred_element_type=jnp.float32)
    y = y * scale_ref[...] + bias_ref[...]              # folded BatchNorm (inference)
    if is_activation:
        y = jnp.maximum(y, 0.0)
    o_ref[...] = y.astype(o_ref.dtype)


def conv_br_1d(x, weight, gamma, beta, running_mean, running_var, *,
               stride: int = 1, padding: int = 0, dilation: int = 1,
               groups: int = 1, is_activation: bool = True, eps: float = 1e-5,
               compute_dtype=jnp.float32):
    """x: (N, Cin, L), weight: (Cout, Cin, K). Returns (N, Cout, Lout) (NCL)."""
    assert groups == 1, "TODO(synk): grouped conv not implemented"
    N, Cin, L = x.shape
    Cout, Cin_w, K = weight.shape
    assert Cin_w == Cin

    H = dilation * (K - 1)                              # receptive-field halo
    Lpad = L + 2 * padding
    Lout1 = Lpad - H                                    # stride-1 output length
    assert Lout1 > 0

    # ---- pick the Lout tile: largest power-of-two multiple of 128 under budget ----
    in_sz = jnp.dtype(compute_dtype).itemsize
    out_sz = jnp.dtype(x.dtype).itemsize

    def step_bytes(tl):  # double-buffered x/out streams + staging scratch
        return 2 * (Cin * tl * in_sz + Cout * tl * out_sz) + K * Cin * tl * in_sz

    TL = _TL_TARGET
    while TL > 128 and step_bytes(TL) > _TILE_BYTE_BUDGET:
        TL //= 2
    if Lout1 <= TL:
        TL, num_tiles = Lout1, 1                        # single full-extent tile
    else:
        num_tiles = -(-Lout1 // TL)
    Hpad = max(H, 1)
    LM = num_tiles * TL                                 # padded stride-1 output length

    # ---- glue (plain JAX): BN fold, weight flatten, pad + tiny halo gather ----
    scale = (gamma / jnp.sqrt(running_var + eps)).astype(jnp.float32)       # (Cout,)
    bias = (beta - running_mean * scale).astype(jnp.float32)                # (Cout,)
    scale2 = scale.reshape(Cout, 1)
    bias2 = bias.reshape(Cout, 1)
    # w2[o, k*Cin + c] = weight[o, c, k]  (matches staging-row order in-kernel)
    w2 = jnp.transpose(weight, (0, 2, 1)).reshape(Cout, K * Cin).astype(compute_dtype)

    right = LM + Hpad - (L + padding)
    x_pad = jnp.pad(x, ((0, 0), (0, 0), (padding, right))).astype(compute_dtype)
    x_main = x_pad[:, :, :LM]                                               # (N, Cin, LM)
    # Halo side-input: for tile i, columns [(i+1)*TL, (i+1)*TL + Hpad) of padded x.
    idx = (jnp.arange(1, num_tiles + 1) * TL)[:, None] + jnp.arange(Hpad)[None, :]
    halo = jnp.take(x_pad, idx.reshape(-1), axis=2)                          # (N, Cin, T*Hpad)
    halo = halo.reshape(N, Cin, num_tiles, Hpad).transpose(0, 2, 1, 3)
    halo = halo.reshape(N * num_tiles, Cin, Hpad)

    kernel = functools.partial(_convbr1d_kernel, K=K, Cin=Cin, TL=TL,
                               dilation=dilation, is_activation=is_activation)

    out_pad = pl.pallas_call(
        kernel,
        out_shape=jax.ShapeDtypeStruct((N, Cout, LM), x.dtype),
        grid=(N, num_tiles),
        in_specs=[
            pl.BlockSpec((None, Cin, TL), lambda n, i: (n, 0, i)),          # streamed x tile
            pl.BlockSpec((None, Cin, Hpad),
                         lambda n, i: (n * num_tiles + i, 0, 0)),           # halo
            pl.BlockSpec((Cout, K * Cin), lambda n, i: (0, 0)),             # weight (resident)
            pl.BlockSpec((Cout, 1), lambda n, i: (0, 0)),                   # BN scale
            pl.BlockSpec((Cout, 1), lambda n, i: (0, 0)),                   # BN bias
        ],
        out_specs=pl.BlockSpec((None, Cout, TL), lambda n, i: (n, 0, i)),   # lane-dense store
        scratch_shapes=[pltpu.VMEM((K * Cin, TL), compute_dtype)],
        compiler_params=pltpu.CompilerParams(
            dimension_semantics=("parallel", "parallel"),                   # feeds v7x's 2 TCs
            vmem_limit_bytes=40 * 1024 * 1024),
    )(x_main, halo, w2, scale2, bias2)

    out = out_pad if LM == Lout1 else out_pad[:, :, :Lout1]
    if stride > 1:
        out = out[:, :, ::stride]            # TODO(synk): move stride into the kernel
    return out


def _reference(x, weight, gamma, beta, running_mean, running_var, *,
               stride, padding, dilation, is_activation, eps=1e-5):
    y = lax.conv_general_dilated(
        x, weight, window_strides=(stride,), padding=[(padding, padding)],
        rhs_dilation=(dilation,), dimension_numbers=("NCH", "OIH", "NCH"),
        precision=lax.Precision.HIGHEST)
    inv = 1.0 / jnp.sqrt(running_var + eps)
    y = (y - running_mean[None, :, None]) * inv[None, :, None]
    y = y * gamma[None, :, None] + beta[None, :, None]
    if is_activation:
        y = jnp.maximum(y, 0.0)
    return y


def _run_case(key, *, N, Cin, Cout, L, K, stride=1, padding=0, dilation=1,
              is_activation=True):
    kx, kw, kg, kb, km, kv = jax.random.split(key, 6)
    x = jax.random.normal(kx, (N, Cin, L), dtype=jnp.float32)
    weight = jax.random.normal(kw, (Cout, Cin, K), dtype=jnp.float32) * 0.3
    gamma = 1.0 + 0.1 * jax.random.normal(kg, (Cout,), dtype=jnp.float32)
    beta = 0.1 * jax.random.normal(kb, (Cout,), dtype=jnp.float32)
    running_mean = 0.1 * jax.random.normal(km, (Cout,), dtype=jnp.float32)
    running_var = 1.0 + 0.1 * jax.random.uniform(kv, (Cout,), dtype=jnp.float32)

    out = conv_br_1d(x, weight, gamma, beta, running_mean, running_var,
                     stride=stride, padding=padding, dilation=dilation,
                     is_activation=is_activation)
    out = jax.block_until_ready(out)
    ref = _reference(x, weight, gamma, beta, running_mean, running_var,
                     stride=stride, padding=padding, dilation=dilation,
                     is_activation=is_activation)
    np.testing.assert_allclose(np.asarray(out), np.asarray(ref),
                               rtol=1e-5, atol=2e-5)


if __name__ == "__main__":
    key = jax.random.PRNGKey(0)
    k1, k2, k3 = jax.random.split(key, 3)
    # ConvBR1d(in_channels=4, out_channels=8, kernel_size=3, padding=1), small shapes.
    _run_case(k1, N=2, Cin=4, Cout=8, L=16, K=3, padding=1)
    # Long sequence -> multiple Lout tiles: exercises halo stitching + pipelining.
    _run_case(k2, N=2, Cin=8, Cout=16, L=1200, K=3, padding=1)
    # Dilated + strided conv, no activation.
    _run_case(k3, N=2, Cin=4, Cout=8, L=32, K=3, stride=2, padding=2, dilation=2,
              is_activation=False)
    print("KERNEL_OK")
</pallas_src>

<mosaic_0001>
module attributes {stable_mosaic.version = 11 : i64} {
  func.func @_convbr1d_kernel(%arg0: i32, %arg1: i32, %arg2: memref<1x4x16xf32, #tpu.memory_space<vmem>>, %arg3: memref<1x4x2xf32, #tpu.memory_space<vmem>>, %arg4: memref<8x12xf32, #tpu.memory_space<vmem>>, %arg5: memref<8x1xf32, #tpu.memory_space<vmem>>, %arg6: memref<8x1xf32, #tpu.memory_space<vmem>>, %arg7: memref<1x8x16xf32, #tpu.memory_space<vmem>>, %arg8: memref<12x16xf32, #tpu.memory_space<vmem>>) attributes {dimension_semantics = [#tpu.dimension_semantics<parallel>, #tpu.dimension_semantics<parallel>], iteration_bounds = array<i64: 2, 1>, scalar_prefetch = 0 : i64, scratch_operands = 1 : i64, tpu.core_type = #tpu.core_type<tc>, window_params = [{transform_indices = @transform_0, window_bounds = array<i64: 1, 4, 16>}, {transform_indices = @transform_1, window_bounds = array<i64: 1, 4, 2>}, {pipeline_mode = #tpu.pipeline_mode<synchronous>, transform_indices = @transform_2, window_bounds = array<i64: 8, 12>}, {pipeline_mode = #tpu.pipeline_mode<synchronous>, transform_indices = @transform_3, window_bounds = array<i64: 8, 1>}, {pipeline_mode = #tpu.pipeline_mode<synchronous>, transform_indices = @transform_4, window_bounds = array<i64: 8, 1>}, {transform_indices = @transform_5, window_bounds = array<i64: 1, 8, 16>}]} {
    %c0 = arith.constant 0 : index
    %c0_0 = arith.constant 0 : index
    %c0_1 = arith.constant 0 : index
    %0 = vector.load %arg2[%c0, %c0_0, %c0_1] : memref<1x4x16xf32, #tpu.memory_space<vmem>>, vector<1x4x16xf32>
    %1 = vector.shape_cast %0 : vector<1x4x16xf32> to vector<4x16xf32>
    %c0_2 = arith.constant 0 : index
    %c0_3 = arith.constant 0 : index
    %2 = vector.load %arg8[%c0_2, %c0_3] : memref<12x16xf32, #tpu.memory_space<vmem>>, vector<4x16xf32>
    tpu.vector_store %arg8[%c0_2, %c0_3], %1 {strides = array<i32>} : memref<12x16xf32, #tpu.memory_space<vmem>>, vector<4x16xf32>,
    %c0_4 = arith.constant 0 : index
    %c0_5 = arith.constant 0 : index
    %c1 = arith.constant 1 : index
    %3 = vector.load %arg2[%c0_4, %c0_5, %c1] : memref<1x4x16xf32, #tpu.memory_space<vmem>>, vector<1x4x15xf32>
    %4 = vector.shape_cast %3 : vector<1x4x15xf32> to vector<4x15xf32>
    %c4 = arith.constant 4 : index
    %c0_6 = arith.constant 0 : index
    %5 = vector.load %arg8[%c4, %c0_6] : memref<12x16xf32, #tpu.memory_space<vmem>>, vector<4x15xf32>
    tpu.vector_store %arg8[%c4, %c0_6], %4 {strides = array<i32>} : memref<12x16xf32, #tpu.memory_space<vmem>>, vector<4x15xf32>,
    %c0_7 = arith.constant 0 : index
    %c0_8 = arith.constant 0 : index
    %c0_9 = arith.constant 0 : index
    %6 = vector.load %arg3[%c0_7, %c0_8, %c0_9] : memref<1x4x2xf32, #tpu.memory_space<vmem>>, vector<1x4x1xf32>
    %7 = vector.shape_cast %6 : vector<1x4x1xf32> to vector<4x1xf32>
    %c4_10 = arith.constant 4 : index
    %c15 = arith.constant 15 : index
    %8 = vector.load %arg8[%c4_10, %c15] : memref<12x16xf32, #tpu.memory_space<vmem>>, vector<4x1xf32>
    tpu.vector_store %arg8[%c4_10, %c15], %7 {strides = array<i32>} : memref<12x16xf32, #tpu.memory_space<vmem>>, vector<4x1xf32>,
    %c0_11 = arith.constant 0 : index
    %c0_12 = arith.constant 0 : index
    %c2 = arith.constant 2 : index
    %9 = vector.load %arg2[%c0_11, %c0_12, %c2] : memref<1x4x16xf32, #tpu.memory_space<vmem>>, vector<1x4x14xf32>
    %10 = vector.shape_cast %9 : vector<1x4x14xf32> to vector<4x14xf32>
    %c8 = arith.constant 8 : index
    %c0_13 = arith.constant 0 : index
    %11 = vector.load %arg8[%c8, %c0_13] : memref<12x16xf32, #tpu.memory_space<vmem>>, vector<4x14xf32>
    tpu.vector_store %arg8[%c8, %c0_13], %10 {strides = array<i32>} : memref<12x16xf32, #tpu.memory_space<vmem>>, vector<4x14xf32>,
    %c0_14 = arith.constant 0 : index
    %c0_15 = arith.constant 0 : index
    %c0_16 = arith.constant 0 : index
    %12 = vector.load %arg3[%c0_14, %c0_15, %c0_16] : memref<1x4x2xf32, #tpu.memory_space<vmem>>, vector<1x4x2xf32>
    %13 = vector.shape_cast %12 : vector<1x4x2xf32> to vector<4x2xf32>
    %c8_17 = arith.constant 8 : index
    %c14 = arith.constant 14 : index
    %14 = vector.load %arg8[%c8_17, %c14] : memref<12x16xf32, #tpu.memory_space<vmem>>, vector<4x2xf32>
    tpu.vector_store %arg8[%c8_17, %c14], %13 {strides = array<i32>} : memref<12x16xf32, #tpu.memory_space<vmem>>, vector<4x2xf32>,
    %c0_18 = arith.constant 0 : index
    %c0_19 = arith.constant 0 : index
    %15 = vector.load %arg4[%c0_18, %c0_19] : memref<8x12xf32, #tpu.memory_space<vmem>>, vector<8x12xf32>
    %c0_20 = arith.constant 0 : index
    %c0_21 = arith.constant 0 : index
    %16 = vector.load %arg8[%c0_20, %c0_21] : memref<12x16xf32, #tpu.memory_space<vmem>>, vector<12x16xf32>
    %cst = arith.constant dense<0.000000e+00> : vector<8x16xf32>
    %17 = tpu.matmul %15, %16, %cst {dimension_numbers = #tpu.dot_dimension_numbers<[1], [0], [0], [1], [0, 0, 1, 1], [], []>} : vector<8x12xf32>, vector<12x16xf32>, vector<8x16xf32> -> vector<8x16xf32>
    %c0_22 = arith.constant 0 : index
    %c0_23 = arith.constant 0 : index
    %18 = vector.load %arg5[%c0_22, %c0_23] : memref<8x1xf32, #tpu.memory_space<vmem>>, vector<8x1xf32>
    %19 = vector.broadcast %18 : vector<8x1xf32> to vector<8x16xf32>
    %20 = arith.mulf %17, %19 : vector<8x16xf32>
    %c0_24 = arith.constant 0 : index
    %c0_25 = arith.constant 0 : index
    %21 = vector.load %arg6[%c0_24, %c0_25] : memref<8x1xf32, #tpu.memory_space<vmem>>, vector<8x1xf32>
    %22 = vector.broadcast %21 : vector<8x1xf32> to vector<8x16xf32>
    %23 = arith.addf %20, %22 : vector<8x16xf32>
    %cst_26 = arith.constant 0.000000e+00 : f32
    %24 = vector.broadcast %cst_26 : f32 to vector<8x16xf32>
    %25 = arith.maximumf %23, %24 : vector<8x16xf32>
    %c0_27 = arith.constant 0 : index
    %c0_28 = arith.constant 0 : index
    %c0_29 = arith.constant 0 : index
    %26 = vector.load %arg7[%c0_27, %c0_28, %c0_29] : memref<1x8x16xf32, #tpu.memory_space<vmem>>, vector<1x8x16xf32>
    %27 = vector.shape_cast %26 : vector<1x8x16xf32> to vector<8x16xf32>
    %28 = vector.shape_cast %25 : vector<8x16xf32> to vector<1x8x16xf32>
    tpu.vector_store %arg7[%c0_27, %c0_28, %c0_29], %28 {strides = array<i32>} : memref<1x8x16xf32, #tpu.memory_space<vmem>>, vector<1x8x16xf32>,
    return
  }
  func.func @transform_0(%arg0: i32, %arg1: i32) -> (i32, i32, i32) {
    %c0_i32 = arith.constant 0 : i32
    %c0_i32_0 = arith.constant 0 : i32
    return %arg0, %c0_i32, %arg1 : i32, i32, i32
  }
  func.func @transform_1(%arg0: i32, %arg1: i32) -> (i32, i32, i32) {
    %c1_i32 = arith.constant 1 : i32
    %0 = arith.muli %arg0, %c1_i32 : i32
    %1 = arith.addi %0, %arg1 : i32
    %c0_i32 = arith.constant 0 : i32
    %c0_i32_0 = arith.constant 0 : i32
    %c0_i32_1 = arith.constant 0 : i32
    return %1, %c0_i32, %c0_i32_0 : i32, i32, i32
  }
  func.func @transform_2(%arg0: i32, %arg1: i32) -> (i32, i32) {
    %c0_i32 = arith.constant 0 : i32
    %c0_i32_0 = arith.constant 0 : i32
    %c0_i32_1 = arith.constant 0 : i32
    return %c0_i32, %c0_i32_0 : i32, i32
  }
  func.func @transform_3(%arg0: i32, %arg1: i32) -> (i32, i32) {
    %c0_i32 = arith.constant 0 : i32
    %c0_i32_0 = arith.constant 0 : i32
    %c0_i32_1 = arith.constant 0 : i32
    return %c0_i32, %c0_i32_0 : i32, i32
  }
  func.func @transform_4(%arg0: i32, %arg1: i32) -> (i32, i32) {
    %c0_i32 = arith.constant 0 : i32
    %c0_i32_0 = arith.constant 0 : i32
    %c0_i32_1 = arith.constant 0 : i32
    return %c0_i32, %c0_i32_0 : i32, i32
  }
  func.func @transform_5(%arg0: i32, %arg1: i32) -> (i32, i32, i32) {
    %c0_i32 = arith.constant 0 : i32
    %c0_i32_0 = arith.constant 0 : i32
    return %arg0, %c0_i32, %arg1 : i32, i32, i32
  }
}

</mosaic_0001>

<bundles_post_ra>
// kernel: tpu_custom_call.1
= control target key start
LH: loop header
LB: loop body
LE: loop exit
PB: predicated region body
PF: predicated region fallthrough
CT: control target
= control target key end

     0   :  { %10 = vsyncpa [#allocation4], 0  ;;  %s811_s0 = inlined_call_operand.vmem [shape: f32[2,4,16], index: 0, kind: input, shape index: {}]   ;;  %s812_s1 = inlined_call_operand.vmem [shape: f32[2,4,2], index: 1, kind: input, shape index: {}]   ;;  %s813_s2 = inlined_call_operand.vmem [shape: f32[8,12], index: 2, kind: input, shape index: {}]   ;;  %s814_s3 = inlined_call_operand.vmem [shape: f32[8,1], index: 3, kind: input, shape index: {}]   ;;  %s815_s4 = inlined_call_operand.vmem [shape: f32[8,1], index: 4, kind: input, shape index: {}]   ;;  %s816_s5 = inlined_call_operand.hbm [shape: f32[2,8,16], index: 5, kind: output, shape index: {}]  }
   0x1   :  { %12 = vsyncpa [#allocation4 + $0x1], 0  ;;  %s700_s18 = smov 0   ;;  %s702_s19 = smov 0  }
   0x2   :  { %s704_s20 = smov 0   ;;  %s706_s21 = smov 0  }
   0x3   :  { %s708_s22 = smov 0   ;;  %s710_s23 = smov 0  }
   0x4 LB: > { %s496_s24 = sadd.s32 4294967295, %s660_s23   ;;  %s497_s25 = sadd.s32 4294967294, %s660_s23   ;;  %s660_s23 = sphi %s710_s23, %s18_s23   ;;  %s656_s22 = sphi %s708_s22, %s823_s22   ;;  %s652_s21 = sphi %s706_s21, %s822_s21   ;;  %s648_s20 = sphi %s704_s20, %s821_s20   ;;  %s644_s19 = sphi %s702_s19, %s820_s19   ;;  %s640_s18 = sphi %s700_s18, %s819_s18  }
   0x5   : > { %s30_s26 = sadd.s32 1, %s656_s22  ;;  %s158_s27 = sadd.s32 1, %s648_s20 }
   0x6   : > { %p32_p0 = scmp.ge.s32.totalorder %s30_s26, 2  ;;  %p168_p1 = scmp.ne.s32.totalorder %s648_s20, %s644_s19 }
   0x7   : > { %p169_p2 = scmp.eq.s32.totalorder %s496_s24, 1  ;;  %p174_p3 = scmp.ne.s32.totalorder %s644_s19, %s640_s18 }
   0x8   : > { %s825_s26 = smov (%p32_p0, %s30_s26), 0  ;;  %p175_p5 = scmp.eq.s32.totalorder %s497_s25, 1 }
   0x9   : > { %p740_p4 = por %p169_p2, %p168_p1  ;;  %s153_s29 = ssub.s32 %s656_s22, %s825_s26 }
   0xa   : > { %p500_p6 = scmp.ge.s32.totalorder %s660_s23, 1  ;;  %p156_p7 = scmp.eq.s32.totalorder %s153_s29, 0 }
   0xb   : > { %p747_p8 = por %p175_p5, %p174_p3  ;;  %p221_p9 = scmp.lt.s32.totalorder %s660_s23, 3 }
   0xc   : > { %s753_s6 = scalar_select %p156_p7, %s648_s20, %s158_s27  }
   0xd   : > { %p222_p10 = pnand %p500_p6, %p221_p9 }
   0xe   : > { %p256_p11 = scmp.lt.s32.totalorder (!%p222_p10), %s652_s21, 1  ;;  %s663_s15 = smov (!%p222_p10), 126  }
   0xf   : > { %225 = sbr.rel (%p222_p10) target bundleno = 367 (0x16f), region = 40  ;;  %s664_s16 = smov (!%p222_p10), 127  }
  0x10   : > { %s667_s17 = smov (!%p222_p10), 14   ;;  %s668_s24 = smov (!%p222_p10), 15  }
  0x11   : > { %s253_s10 = sand.u32 (!%p222_p10), 1, %s644_s19   ;;  %s507_s12 = sshll.u32 (!%p222_p10), %s652_s21, 7 }
  0x12   : > { %s669_s27 = smov (!%p222_p10), [#allocation3]  }
  0x13   : > { %s588_s29 = sshll.u32 (!%p222_p10), %s669_s27, 4  ;;  %s589_s29 = int_to_ptr.vmem [resolvable:$false] %s588_s29 }
  0x14   : > { %s257_s7 = scalar_select %p256_p11, %s652_s21, 1  ;;  %v662_v0 = vmov 0.0   ;;  %vm270_vm0 = vcmask 125952   ;;  %vm665_vm1 = vmmov 0   ;;  %v666_v6 = vmov 0   ;;  %v381_v7 = vld [vmem:[%s814_s3] sm:$0xff] }
  0x15   : > { %513 = vmatprep.subr.mxu0 %v662_v0  ;;  %517 = vmatprep.mubr.msk.f32.mxu0 %vm665_vm1, %v662_v0  ;;  %v388_v8 = vld [vmem:[%s815_s4] sm:$0xff]  ;;  %vm291_vm2 = vcmask 109568   ;;  %vm277_vm3 = vcmask 117760   ;;  %vm298_vm4 = vcmask 126064   ;;  %vm284_vm5 = vcmask 126072   ;;  %s590_s21 = scalar_lea.vmem %s589_s29, 256 }
  0x16   : > { %s502_s8 = sshll.u32 %s257_s7, 2  ;;  %582 = vset.pattern.permute.xlu0 %v666_v6  ;;  %583 = vset.pattern.permute.xlu1 %v666_v6  ;;  %vm307_vm6 = vcmask 1043456   ;;  %v300_v15 = vld [vmem:[%s813_s2] sm:$0xff]  ;;  %vm303_vm7 = vcmask 97280   ;;  %vm396_vm8 = vcmask 130048  }
  0x17   : > { %s262_s11 = scalar_lea.vmem %s811_s0, %s502_s8  ;;  %s267_s14 = scalar_lea.vmem %s812_s1, %s502_s8 }
  0x18   : > { %v286_v1 = vld [vmem:[%s262_s11] sm:$0xf] }
  0x19   : > { %v269_v2 = vld [vmem:[%s262_s11] sm:$0xf]  ;;  %288 = vrot.lane.b32.xlu0 %v286_v1, %s663_s15 }
  0x1a   : > { %v272_v3 = vld [vmem:[%s262_s11] sm:$0xf]  ;;  %271 = vst.msk [vmem:[#allocation2] sm:$0xf] %vm270_vm0, %v269_v2  ;;  %s501_s11 = sshll.u32 %s253_s10, 3 }
  0x1b   : > { %274 = vrot.lane.b32.xlu1 %v272_v3, %s664_s16  ;;  %v293_v4 = vld [vmem:[%s267_s14] sm:$0xf]  ;;  %s255_s13 = scalar_lea.vmem [#allocation3], %s501_s11 }
  0x1c   : > { %v279_v5 = vld [vmem:[%s267_s14] sm:$0xf]  ;;  %s413_s14 = sshll.u32 %s255_s13, 4  ;;  %s414_s14 = int_to_ptr.vmem [resolvable:$true] %s413_s14 }
  0x1d   : > { %295 = vrot.lane.b32.xlu0 %v293_v4, %s667_s17  ;;  %s411_s17 = scalar_lea.hbm %s816_s5, %s507_s12  ;;  %s584_s25 = scalar_lea.vmem %s414_s14, 128 }
  0x1e   : > { %p585_p12 = scmp.ne.s32.totalorder %s414_s14, %s584_s25  ;;  %p591_p1 = scmp.lt.s32.totalorder %s414_s14, %s589_s29 }
  0x1f   : > { %281 = vrot.lane.b32.xlu1 %v279_v5, %s668_s24  ;;  %s399_s24 = scalar_lea.sflag [#allocation4], %s253_s10  ;;  %p592_p2 = scmp.lt.s32.totalorder %s590_s21, %s584_s25 }
  0x20   : > { %p586_p13 = pnand %p585_p12, %p740_p4 }
  0x21   : > { %384 = vperm.xlu0 %582, %v381_v7   ;;  %p593_p3 = por %p592_p2, %p591_p1 }
  0x22   : > { %p587_p0 = pneg %p586_p13 }
  0x23   : > { %391 = vperm.xlu1 %583, %v388_v8  }
  0x24   : > { %p594_p5 = pnand %p593_p3, %p587_p0 }
  0x8b   : > { %v289_v9 = vpop.permute.xlu0 %288 }
  0x8c   : > { %292 = vst.msk [vmem:[#allocation2 + $0x8] sm:$0xf] %vm291_vm2, %v289_v9 }
  0x8d   : > { %v275_v10 = vpop.permute.xlu1 %274 }
  0x8e   : > { %278 = vst.msk [vmem:[#allocation2 + $0x4] sm:$0xf] %vm277_vm3, %v275_v10 }
  0x8f   : > { %v296_v11 = vpop.permute.xlu0 %295 }
  0x90   : > { %299 = vst.msk [vmem:[#allocation2 + $0x8] sm:$0xf] %vm298_vm4, %v296_v11 }
  0x91   : > { %v282_v12 = vpop.permute.xlu1 %281 }
  0x92   : > { %285 = vst.msk [vmem:[#allocation2 + $0x4] sm:$0xf] %vm284_vm5, %v282_v12 }
  0x97   : > { %v302_v13 = vld [vmem:[#allocation2 + $0x8] sm:$0xf] }
  0x98   : > { %514 = vmatpush3.msk.msra.mxu0 %vm307_vm6, %v302_v13 }
  0x99   : > { %v301_v14 = vld [vmem:[#allocation2] sm:$0xff]  ;;  %515 = vmatprep.subr.mxu0 %v662_v0 }
  0x9a   : > { %516 = vmatpush3.msra.mxu0 %v301_v14 }
  0x9b   : > { %518 = vmatmul.mubr.msk.f32.vlgmr.msra.gmra.mxu0 %vm303_vm7, %v300_v15 }
  0x9c   : > { %v385_v16 = vpop.permute.xlu0 %384 }
  0x9e   : > { %v392_v18 = vpop.permute.xlu1 %391 }
 0x15b   : > { %v377_v17 = vpop.f32.mrf.mxu0 }
 0x15c   : > { %v387_v19 = vmul.f32 %v385_v16, %v377_v17 }
 0x15d   : > { %v519_v20 = vpop.f32.mrf.mxu0 }
 0x15e   : > { %v394_v21 = vadd.f32 %v392_v18, %v387_v19 }
 0x160   : > { %v395_v22 = vmax.f32 %v394_v21, 0.0 }
 0x162   : > { %397 = vst.msk [vmem:[%s255_s13] sm:$0xff] %vm396_vm8, %v395_v22 }
 0x163   : > { %597 = shalt.err (!%p594_p5)
}
 0x164   : > { %s598_s7 = scalar_lea.hbm %s411_s17, 128  ;;  %s602_s10 = scalar_lea.hbm %s816_s5, 256 }
 0x165   : > { %p599_p6 = scmp.ne.s32.totalorder %s411_s17, %s598_s7  ;;  %p603_p10 = scmp.lt.s32.totalorder %s411_s17, %s816_s5 }
 0x166   : > { %p604_p11 = scmp.lt.s32.totalorder %s602_s10, %s598_s7 }
 0x167   : > { %p600_p7 = pnand %p599_p6, %p740_p4 }
 0x168   : > { %p605_p12 = por %p604_p11, %p603_p10 }
 0x169   : > { %p601_p9 = pneg %p600_p7 }
 0x16b   : > { %p606_p13 = pnand %p605_p12, %p601_p9 }
 0x16d   : > { %609 = shalt.err (!%p606_p13)
}
 0x16e   : > { %520 = dma.vmem_to_hbm [thread:$0]  (%p740_p4), %s414_s14, 128, %s411_s17, %s399_s24  }
 0x16f PF: > { %p526_p0 = scmp.ge.s32.totalorder %s660_s23, 2  ;;  %s425_s13 = sand.u32 1, %s640_s18  }
 0x170   : > { %s426_s15 = scalar_lea.sflag [#allocation4], %s425_s13 }
 0x171   : > { %p523_p1 = pnand %p526_p0, %p747_p8 }
 0x173   : > { %p524_p2 = pneg %p523_p1 }
 0x175   : > { %635 = dma.done.wait (%p524_p2), %s426_s15, 128  }
 0x176   : > { %637 = vsyncadd (%p524_p2), %s426_s15, 4294967168  ;;  %s18_s23 = sadd.s32 1, %s660_s23   ;;  %s819_s18 = smov %s644_s19 }
 0x177   : > { %p15_p3 = scmp.ge.s32.totalorder %s18_s23, 4   ;;  %s820_s19 = smov %s648_s20 }
 0x178   : > { %s821_s20 = smov %s753_s6  ;;  %s822_s21 = smov %s656_s22 }
 0x179   : > { %s823_s22 = smov %s825_s26  ;;  %17 = sbr.rel (!%p15_p3) target bundleno = 4 (0x4), region = 78 }
 0x17e   :  { %431 = vsyncpa [#allocation4], 1 }
 0x17f   :  { %433 = vsyncpa [#allocation4 + $0x1], 1 }

</bundles_post_ra>
